<compile_context>
chip_gen: v7x
topology: tpu7x:2x2x1
jax: 0.10.0
libtpu: 0.0.40
codegen_flags: <defaults>
</compile_context>

<pallas_src>
import functools

import jax
import jax.numpy as jnp
from jax.experimental import pallas as pl
from jax.experimental.pallas import tpu as pltpu


def _round_up(x, m):
    return ((x + m - 1) // m) * m


def _matching_kernel(batch_ref, x_ref, w_ref, o_ref, *,
                     total_nodes, tile_n, mask_rows):
    # batch_ref: (1, TILE_N) int32  -- graph id per node (padding cols = -1)
    # x_ref:     (TILE_N, H)        -- node-embedding tile (bf16 or f32)
    # w_ref:     (H, H)             -- weight matrix (resident)
    # o_ref:     (G_pad, H) f32     -- resident accumulator / final output
    step = pl.program_id(0)

    @pl.when(step == 0)
    def _():
        o_ref[...] = jnp.zeros_like(o_ref)

    g_pad = o_ref.shape[0]
    rows = x_ref.shape[0]

    x = x_ref[...]
    if mask_rows:
        # Kill out-of-bounds rows of the (possibly ragged) last tile with a
        # select (NOT a multiply: 0 * NaN garbage would still be NaN).
        valid = total_nodes - step * tile_n
        row_iota = jax.lax.broadcasted_iota(jnp.int32, x.shape, 0)
        x = jnp.where(row_iota < valid, x, jnp.zeros_like(x))

    # Per-tile one-hot segment matrix: onehot[g, n] = (batch[n] == g).
    graph_iota = jax.lax.broadcasted_iota(jnp.int32, (g_pad, rows), 0)
    onehot = (batch_ref[...] == graph_iota).astype(x.dtype)          # (G_pad, TILE_N)

    # Pool first (linear): segment-sum accumulated in f32 in the output block.
    o_ref[...] += jnp.dot(onehot, x, preferred_element_type=jnp.float32)

    @pl.when(step == pl.num_programs(0) - 1)
    def _():
        pooled = o_ref[...]                                          # (G_pad, H) f32
        w = w_ref[...].astype(jnp.float32)
        o_ref[...] = jnp.tanh(
            jnp.dot(pooled, w, preferred_element_type=jnp.float32))


def matching_module_forward(embedding, batch, weight, num_graphs, *,
                            compute_dtype=jnp.bfloat16, tile_n=None):
    """embedding: (N, H), batch: (N,) int graph ids, weight: (H, H)."""
    n, h = embedding.shape
    assert weight.shape == (h, h)

    if n == 0 or num_graphs == 0:
        # tanh(0 @ W) == 0 for empty graphs / empty batches.
        return jnp.zeros((num_graphs, h), jnp.float32)

    in_dtype = jnp.dtype(compute_dtype) if compute_dtype is not None else embedding.dtype
    x = embedding.astype(in_dtype)
    w = weight.astype(in_dtype)
    bytes_per = jnp.dtype(in_dtype).itemsize

    g_pad = _round_up(max(num_graphs, 8), 8)

    # H-aware tile choice: largest multiple-of-128 node tile whose
    # double-buffered copy fits a conservative VMEM budget (v7x-safe).
    if tile_n is None:
        budget = 16 * 1024 * 1024
        tile_n = max(128, min(budget // (2 * h * bytes_per), 8192))
    tile_n = min(tile_n, _round_up(n, 128))
    tile_n = max(128, (tile_n // 128) * 128)

    n_pad = _round_up(n, tile_n)
    num_tiles = n_pad // tile_n

    # Only the tiny (1, N) id row is padded/copied; padded nodes get id -1
    # (never matched), and out-of-range ids are silently dropped, matching
    # segment_sum semantics.
    b_p = jnp.full((1, n_pad), -1, dtype=jnp.int32).at[0, :n].set(
        batch.astype(jnp.int32))

    kernel = functools.partial(
        _matching_kernel,
        total_nodes=n, tile_n=tile_n, mask_rows=(n != n_pad))

    # VMEM: double-buffered x tile + ids + weight + resident f32 output.
    vmem_needed = (2 * tile_n * h * bytes_per + 2 * tile_n * 4
                   + 2 * h * h * bytes_per + 2 * g_pad * h * 4)
    vmem_limit = int(min(max(2 * vmem_needed, 32 * 1024 * 1024),
                         64 * 1024 * 1024))

    out_padded = pl.pallas_call(
        kernel,
        out_shape=jax.ShapeDtypeStruct((g_pad, h), jnp.float32),
        grid_spec=pltpu.PrefetchScalarGridSpec(
            num_scalar_prefetch=0,
            grid=(num_tiles,),
            in_specs=[
                pl.BlockSpec((1, tile_n), lambda i: (0, i)),      # batch ids
                pl.BlockSpec((tile_n, h), lambda i: (i, 0)),      # embedding tile
                pl.BlockSpec((h, h), lambda i: (0, 0)),           # weight (resident)
            ],
            out_specs=pl.BlockSpec((g_pad, h), lambda i: (0, 0)),  # resident accumulator
        ),
        compiler_params=pltpu.CompilerParams(
            dimension_semantics=("arbitrary",),   # node axis is a reduction
            vmem_limit_bytes=vmem_limit,
        ),
    )(b_p, x, w)

    return out_padded[:num_graphs, :]


def xavier_uniform(key, shape, dtype=jnp.float32):
    fan_in, fan_out = shape[0], shape[1]
    bound = (6.0 / (fan_in + fan_out)) ** 0.5
    return jax.random.uniform(key, shape, dtype=dtype, minval=-bound, maxval=bound)


def reference_forward(embedding, batch, weight, num_graphs):
    xw = jnp.dot(embedding, weight, preferred_element_type=jnp.float32)
    pooled = jax.ops.segment_sum(xw, batch, num_segments=num_graphs)
    return jnp.tanh(pooled)


if __name__ == "__main__":
    key = jax.random.PRNGKey(0)
    k_emb, k_w, k_emb2 = jax.random.split(key, 3)

    hidden_dim = 32          # args.hidden_dim[-1]
    num_nodes = 8            # total nodes across the batch of graphs
    num_graphs = 2

    embedding = jax.random.normal(k_emb, (num_nodes, hidden_dim), dtype=jnp.float32)
    # nodes 0..3 -> graph 0, nodes 4..7 -> graph 1
    batch = jnp.array([0, 0, 0, 0, 1, 1, 1, 1], dtype=jnp.int32)
    weight = xavier_uniform(k_w, (hidden_dim, hidden_dim))

    # 1) Exact-f32 path vs f32 reference.
    out_f32 = jax.block_until_ready(
        matching_module_forward(embedding, batch, weight, num_graphs,
                                compute_dtype=jnp.float32))
    ref_f32 = reference_forward(embedding, batch, weight, num_graphs)
    assert out_f32.shape == (num_graphs, hidden_dim)
    assert jnp.allclose(out_f32, ref_f32, atol=1e-5, rtol=1e-5), "f32 mismatch"

    # 2) Default bf16-input path (f32 accumulation) vs a bf16-input reference.
    out_bf16 = jax.block_until_ready(
        matching_module_forward(embedding, batch, weight, num_graphs))
    ref_bf16 = reference_forward(
        embedding.astype(jnp.bfloat16).astype(jnp.float32), batch,
        weight.astype(jnp.bfloat16).astype(jnp.float32), num_graphs)
    assert out_bf16.shape == (num_graphs, hidden_dim)
    assert jnp.allclose(out_bf16, ref_bf16, atol=2e-2, rtol=2e-2), "bf16 mismatch"

    # 3) Ragged multi-tile path: N not a multiple of tile_n, several node tiles.
    n2, g2 = 300, 3
    emb2 = jax.random.normal(k_emb2, (n2, hidden_dim), dtype=jnp.float32)
    batch2 = jnp.concatenate([jnp.zeros((120,), jnp.int32),
                              jnp.ones((100,), jnp.int32),
                              jnp.full((80,), 2, jnp.int32)])
    out2 = jax.block_until_ready(
        matching_module_forward(emb2, batch2, weight, g2,
                                compute_dtype=jnp.float32, tile_n=128))
    ref2 = reference_forward(emb2, batch2, weight, g2)
    assert out2.shape == (g2, hidden_dim)
    assert jnp.allclose(out2, ref2, atol=1e-4, rtol=1e-4), "ragged mismatch"

    print("KERNEL_OK")
</pallas_src>

<mosaic_0001>
module attributes {stable_mosaic.version = 11 : i64} {
  func.func @_matching_kernel(%arg0: i32, %arg1: memref<1x128xi32, #tpu.memory_space<vmem>>, %arg2: memref<128x32xf32, #tpu.memory_space<vmem>>, %arg3: memref<32x32xf32, #tpu.memory_space<vmem>>, %arg4: memref<8x32xf32, #tpu.memory_space<vmem>>) attributes {dimension_semantics = [#tpu.dimension_semantics<arbitrary>], iteration_bounds = array<i64: 1>, scalar_prefetch = 0 : i64, scratch_operands = 0 : i64, tpu.core_type = #tpu.core_type<tc>, window_params = [{transform_indices = @transform_0, window_bounds = array<i64: 1, 128>}, {transform_indices = @transform_1, window_bounds = array<i64: 128, 32>}, {pipeline_mode = #tpu.pipeline_mode<synchronous>, transform_indices = @transform_2, window_bounds = array<i64: 32, 32>}, {pipeline_mode = #tpu.pipeline_mode<synchronous>, transform_indices = @transform_3, window_bounds = array<i64: 8, 32>}]} {
    %c0_i32 = arith.constant 0 : i32
    %0 = arith.cmpi eq, %arg0, %c0_i32 : i32
    %1 = arith.extui %0 : i1 to i32
    %c0_i32_0 = arith.constant 0 : i32
    %2 = arith.cmpi ne, %1, %c0_i32_0 : i32
    scf.if %2 {
      %cst_11 = arith.constant 0.000000e+00 : f32
      %24 = vector.broadcast %cst_11 : f32 to vector<8x32xf32>
      %c0_12 = arith.constant 0 : index
      %c0_13 = arith.constant 0 : index
      %25 = vector.load %arg4[%c0_12, %c0_13] : memref<8x32xf32, #tpu.memory_space<vmem>>, vector<8x32xf32>
      tpu.vector_store %arg4[%c0_12, %c0_13], %24 {strides = array<i32>} : memref<8x32xf32, #tpu.memory_space<vmem>>, vector<8x32xf32>,
    } else {
    }
    %c0 = arith.constant 0 : index
    %c0_1 = arith.constant 0 : index
    %3 = vector.load %arg2[%c0, %c0_1] : memref<128x32xf32, #tpu.memory_space<vmem>>, vector<128x32xf32>
    %c128_i32 = arith.constant 128 : i32
    %4 = arith.muli %arg0, %c128_i32 : i32
    %c8_i32 = arith.constant 8 : i32
    %5 = arith.subi %c8_i32, %4 : i32
    %6 = tpu.iota {dimensions = array<i32: 0>} : vector<128x32xi32>
    %7 = vector.broadcast %5 : i32 to vector<128x32xi32>
    %8 = arith.cmpi slt, %6, %7 : vector<128x32xi32>
    %cst = arith.constant 0.000000e+00 : f32
    %9 = vector.broadcast %cst : f32 to vector<128x32xf32>
    %10 = arith.select %8, %3, %9 : vector<128x32xi1>, vector<128x32xf32>
    %11 = tpu.iota {dimensions = array<i32: 0>} : vector<8x128xi32>
    %c0_2 = arith.constant 0 : index
    %c0_3 = arith.constant 0 : index
    %12 = vector.load %arg1[%c0_2, %c0_3] : memref<1x128xi32, #tpu.memory_space<vmem>>, vector<1x128xi32>
    %13 = vector.broadcast %12 : vector<1x128xi32> to vector<8x128xi32>
    %14 = arith.cmpi eq, %13, %11 : vector<8x128xi32>
    %15 = arith.extui %14 : vector<8x128xi1> to vector<8x128xi32>
    %16 = arith.sitofp %15 : vector<8x128xi32> to vector<8x128xf32>
    %c0_4 = arith.constant 0 : index
    %c0_5 = arith.constant 0 : index
    %17 = vector.load %arg4[%c0_4, %c0_5] : memref<8x32xf32, #tpu.memory_space<vmem>>, vector<8x32xf32>
    %cst_6 = arith.constant dense<0.000000e+00> : vector<8x32xf32>
    %18 = tpu.matmul %16, %10, %cst_6 {dimension_numbers = #tpu.dot_dimension_numbers<[1], [0], [0], [1], [0, 0, 1, 1], [], []>} : vector<8x128xf32>, vector<128x32xf32>, vector<8x32xf32> -> vector<8x32xf32>
    %19 = arith.addf %17, %18 : vector<8x32xf32>
    %c0_7 = arith.constant 0 : index
    %c0_8 = arith.constant 0 : index
    %20 = vector.load %arg4[%c0_7, %c0_8] : memref<8x32xf32, #tpu.memory_space<vmem>>, vector<8x32xf32>
    tpu.vector_store %arg4[%c0_7, %c0_8], %19 {strides = array<i32>} : memref<8x32xf32, #tpu.memory_space<vmem>>, vector<8x32xf32>,
    %c0_i32_9 = arith.constant 0 : i32
    %21 = arith.cmpi eq, %arg0, %c0_i32_9 : i32
    %22 = arith.extui %21 : i1 to i32
    %c0_i32_10 = arith.constant 0 : i32
    %23 = arith.cmpi ne, %22, %c0_i32_10 : i32
    scf.if %23 {
      %c0_11 = arith.constant 0 : index
      %c0_12 = arith.constant 0 : index
      %24 = vector.load %arg4[%c0_11, %c0_12] : memref<8x32xf32, #tpu.memory_space<vmem>>, vector<8x32xf32>
      %c0_13 = arith.constant 0 : index
      %c0_14 = arith.constant 0 : index
      %25 = vector.load %arg3[%c0_13, %c0_14] : memref<32x32xf32, #tpu.memory_space<vmem>>, vector<32x32xf32>
      %cst_15 = arith.constant dense<0.000000e+00> : vector<8x32xf32>
      %26 = tpu.matmul %24, %25, %cst_15 {dimension_numbers = #tpu.dot_dimension_numbers<[1], [0], [0], [1], [0, 0, 1, 1], [], []>} : vector<8x32xf32>, vector<32x32xf32>, vector<8x32xf32> -> vector<8x32xf32>
      %27 = math.tanh %26 : vector<8x32xf32>
      %c0_16 = arith.constant 0 : index
      %c0_17 = arith.constant 0 : index
      %28 = vector.load %arg4[%c0_16, %c0_17] : memref<8x32xf32, #tpu.memory_space<vmem>>, vector<8x32xf32>
      tpu.vector_store %arg4[%c0_16, %c0_17], %27 {strides = array<i32>} : memref<8x32xf32, #tpu.memory_space<vmem>>, vector<8x32xf32>,
    } else {
    }
    return
  }
  func.func @transform_0(%arg0: i32) -> (i32, i32) {
    %c0_i32 = arith.constant 0 : i32
    %c0_i32_0 = arith.constant 0 : i32
    return %c0_i32, %arg0 : i32, i32
  }
  func.func @transform_1(%arg0: i32) -> (i32, i32) {
    %c0_i32 = arith.constant 0 : i32
    %c0_i32_0 = arith.constant 0 : i32
    return %arg0, %c0_i32 : i32, i32
  }
  func.func @transform_2(%arg0: i32) -> (i32, i32) {
    %c0_i32 = arith.constant 0 : i32
    %c0_i32_0 = arith.constant 0 : i32
    %c0_i32_1 = arith.constant 0 : i32
    return %c0_i32, %c0_i32_0 : i32, i32
  }
  func.func @transform_3(%arg0: i32) -> (i32, i32) {
    %c0_i32 = arith.constant 0 : i32
    %c0_i32_0 = arith.constant 0 : i32
    %c0_i32_1 = arith.constant 0 : i32
    return %c0_i32, %c0_i32_0 : i32, i32
  }
}

</mosaic_0001>

<bundles_post_ra>
// kernel: tpu_custom_call.1
= control target key start
LH: loop header
LB: loop body
LE: loop exit
PB: predicated region body
PF: predicated region fallthrough
CT: control target
= control target key end

     0   :  { %8 = vsyncpa [#allocation3], 0  ;;  %s530_s0 = inlined_call_operand.hbm [shape: s32[1,128], index: 0, kind: input, shape index: {}]   ;;  %s531_s1 = inlined_call_operand.hbm [shape: f32[8,32], index: 1, kind: input, shape index: {}]   ;;  %s532_s2 = inlined_call_operand.hbm [shape: f32[32,32], index: 2, kind: input, shape index: {}]   ;;  %s533_s3 = inlined_call_operand.hbm [shape: f32[8,32], index: 3, kind: output, shape index: {}]  }
   0x1   :  { %9 = vsyncpa [#allocation6], 0 }
   0x2   :  { %10 = vsyncpa [#allocation4], 0  ;;  %s448_s12 = smov [#allocation2]   ;;  %s354_s16 = scalar_lea.hbm %s530_s0, 16 }
   0x3   :  { %s17_s13 = sshll.u32 %s448_s12, 4  ;;  %p355_p0 = scmp.ne.s32.totalorder %s530_s0, %s354_s16  ;;  %s18_s13 = int_to_ptr.vmem [resolvable:$true] %s17_s13 }
   0x4   :  { %p358_p1 = scmp.lt.u32.totalorder %s354_s16, %s530_s0 }
   0x6   :  { %p360_p2 = pnand %p358_p1, %p355_p0 }
   0x8   :  { %363 = shalt.err (!%p360_p2)
}
   0x9   :  { %s364_s21 = scalar_lea.vmem %s18_s13, 16  ;;  %s368_s22 = scalar_lea.vmem %s18_s13, 32 }
   0xa   :  { %p365_p3 = scmp.ne.s32.totalorder %s18_s13, %s364_s21  ;;  %p369_p4 = scmp.lt.s32.totalorder %s18_s13, %s18_s13 }
   0xb   :  { %p370_p5 = scmp.lt.s32.totalorder %s368_s22, %s364_s21 }
   0xd   :  { %p371_p6 = por %p370_p5, %p369_p4 }
   0xf   :  { %p372_p7 = pnand %p371_p6, %p365_p3 }
  0x11   :  { %375 = shalt.err (!%p372_p7)
}
  0x12   :  { %20 = dma.hbm_to_vmem [thread:$0]  %s530_s0, 16, %s18_s13, [#allocation3]  }
  0x13   :  { %25 = vsyncadd [#allocation6], 1920  ;;  %s449_s25 = smov [#allocation5]   ;;  %s376_s29 = scalar_lea.hbm %s531_s1, 128 }
  0x14   :  { %s26_s26 = sshll.u32 %s449_s25, 4  ;;  %p377_p8 = scmp.ne.s32.totalorder %s531_s1, %s376_s29  ;;  %s27_s26 = int_to_ptr.vmem [resolvable:$true] %s26_s26 }
  0x15   :  { %p380_p9 = scmp.lt.u32.totalorder %s376_s29, %s531_s1 }
  0x17   :  { %p382_p10 = pnand %p380_p9, %p377_p8 }
  0x19   :  { %385 = shalt.err (!%p382_p10)
}
  0x1a   :  { %s386_s7 = scalar_lea.vmem %s27_s26, 128  ;;  %s390_s0 = scalar_lea.vmem %s27_s26, 2048 }
  0x1b   :  { %p387_p11 = scmp.ne.s32.totalorder %s27_s26, %s386_s7  ;;  %p391_p12 = scmp.lt.s32.totalorder %s27_s26, %s27_s26 }
  0x1c   :  { %p392_p13 = scmp.lt.s32.totalorder %s390_s0, %s386_s7 }
  0x1e   :  { %p393_p0 = por %p392_p13, %p391_p12 }
  0x20   :  { %p394_p1 = pnand %p393_p0, %p387_p11 }
  0x22   :  { %397 = shalt.err (!%p394_p1)
}
  0x23   :  { %s450_s8 = smov 128   ;;  %s451_s9 = smov 8  }
  0x24   :  { %32 = dma.hbm_to_vmem [thread:$0]  %s531_s1, 128, %s27_s26, [#allocation6], %s450_s8, %s450_s8, %s451_s9  }
  0x25   :  { %s452_s12 = smov [#allocation7]   ;;  %s398_s16 = scalar_lea.hbm %s532_s2, 512 }
  0x26   :  { %s38_s13 = sshll.u32 %s452_s12, 4  ;;  %p399_p2 = scmp.ne.s32.totalorder %s532_s2, %s398_s16  ;;  %s39_s13 = int_to_ptr.vmem [resolvable:$true] %s38_s13 }
  0x27   :  { %p402_p3 = scmp.lt.u32.totalorder %s398_s16, %s532_s2 }
  0x29   :  { %p404_p4 = pnand %p402_p3, %p399_p2 }
  0x2b   :  { %407 = shalt.err (!%p404_p4)
}
  0x2c   :  { %s408_s21 = scalar_lea.vmem %s39_s13, 512  ;;  %p413_p6 = scmp.lt.s32.totalorder %s39_s13, %s39_s13 }
  0x2d   :  { %p409_p5 = scmp.ne.s32.totalorder %s39_s13, %s408_s21  ;;  %p414_p7 = scmp.lt.s32.totalorder %s408_s21, %s408_s21 }
  0x2f   :  { %p415_p8 = por %p414_p7, %p413_p6 }
  0x31   :  { %p416_p9 = pnand %p415_p8, %p409_p5 }
  0x33   :  { %419 = shalt.err (!%p416_p9)
}
  0x34   :  { %44 = dma.hbm_to_vmem [thread:$0]  %s532_s2, 512, %s39_s13, [#allocation6], %s450_s8, %s450_s8, %s451_s9  }
  0x35   :  { %442 = dma.done.wait [#allocation3], 16  }
  0x36   :  { %443 = vsyncadd [#allocation3], 4294967280 }
  0x37   :  { %444 = dma.done.wait [#allocation6], 2560  }
  0x38   :  { %445 = vsyncadd [#allocation6], 4294964736  ;;  %v78_v0 = vlaneseq  ;;  %v453_v1 = vmov 0.0   ;;  %vm454_vm0 = vmmov 0   ;;  %vm58_vm1 = vcmask 261120   ;;  %v60_v3 = vld [vmem:[#allocation5] sm:$0xff] }
  0x39   :  { %320 = vmatprep.subr.mxu0 %v453_v1  ;;  %322 = vmatprep.mubr.msk.f32.mxu0 %vm454_vm0, %v453_v1  ;;  %59 = vst.msk [vmem:[#allocation8] sm:$0xff] %vm58_vm1, %v453_v1  ;;  %v309_v4 = vld [vmem:[#allocation2] ss:$0 sm:$0xff]  ;;  %v455_v5 = vmov 1.0   ;;  %v214_v6 = vld [vmem:[#allocation7] sm:$0xff]  ;;  %v215_v7 = vld [vmem:[#allocation7 + $0x8] sm:$0xff] }
  0x3a   :  { %333 = vmatprep.mubr.msk.f32.mxu1 %vm454_vm0, %v453_v1  ;;  %v79_v2 = vshrl.u32 %v78_v0, 7  ;;  %321 = vmatpush3.msra.mxu0 %v60_v3  ;;  %v337_v8 = vpack.c.bf16 %v215_v7, %v214_v6  ;;  %v456_v9 = vmov 0.0|0.0   ;;  %v216_v10 = vld [vmem:[#allocation7 + $0x10] sm:$0xff]  ;;  %v217_v11 = vld [vmem:[#allocation7 + $0x18] sm:$0xff]  ;;  %s457_s2 = smov [#allocation8]  }
  0x3b   :  { %336 = vmatprep.subr.bf16.mxu1 %v456_v9  ;;  %v340_v12 = vpack.c.bf16 %v217_v11, %v216_v10  ;;  %s299_s23 = sshll.u32 %s457_s2, 4  ;;  %s300_s23 = int_to_ptr.vmem [resolvable:$true] %s299_s23 }
  0x3c   :  { %vm133_vm2 = vcmp.eq.s32.totalorder %v309_v4, %v79_v2  ;;  %338 = vmatpush3.bf16.msra.mxu1 %v337_v8  ;;  %s420_s24 = scalar_lea.vmem %s300_s23, 128  ;;  %p425_p11 = scmp.lt.s32.totalorder %s300_s23, %s300_s23 }
  0x3d   :  { %323 = vmatmul.mubr.msk.f32.vlgmr.msra.gmra.mrb[0].mxu0 %vm133_vm2, %v455_v5  ;;  %339 = vmatprep.subr.bf16.mxu1 %v456_v9  ;;  %p421_p10 = scmp.ne.s32.totalorder %s300_s23, %s420_s24  ;;  %p426_p12 = scmp.lt.s32.totalorder %s420_s24, %s420_s24 }
  0x3f   :  { %p427_p13 = por %p426_p12, %p425_p11 }
  0x40   :  { %341 = vmatpush3.bf16.msra.mxu1 %v340_v12  ;;  %v136_v13 = vld [vmem:[#allocation8] sm:$0xff] }
  0x41   :  { %p428_p0 = pnand %p427_p13, %p421_p10 }
 0x110   :  { %v203_v14 = vpop.f32.mrb[0].mxu0 }
 0x111   :  { %v207_v15 = vadd.f32 %v203_v14, %v136_v13  ;;  %v324_v16 = vpop.f32.mrb[1].mxu0 }
 0x113   :  { %209 = vst.msk [vmem:[#allocation8] sm:$0xff] %vm58_vm1, %v207_v15 }
 0x11a   :  { %v213_v17 = vld [vmem:[#allocation8] sm:$0xff] }
 0x11b   :  { %334 = vmatmul.mubr.msk.f32.vlgmr.msra.gmra.mrb[0].mxu1 %vm58_vm1, %v213_v17 }
 0x1ee   :  { %v287_v18 = vpop.f32.mrb[0].mxu1 }
 0x1ef   :  { %352 = vtanh.f32 %v287_v18  ;;  %v335_v19 = vpop.f32.mrb[1].mxu1 }
 0x1f9   :  { %v353_v20 = vpop.eup %352 }
 0x1fa   :  { %292 = vst.msk [vmem:[#allocation8] sm:$0xff] %vm58_vm1, %v353_v20 }
 0x1fb   :  { %431 = shalt.err (!%p428_p0)
}
 0x1fc   :  { %s432_s27 = scalar_lea.hbm %s533_s3, 128 }
 0x1fd   :  { %p433_p1 = scmp.ne.s32.totalorder %s533_s3, %s432_s27  ;;  %p436_p2 = scmp.lt.u32.totalorder %s432_s27, %s533_s3 }
 0x1ff   :  { %p438_p3 = pnand %p436_p2, %p433_p1 }
 0x201   :  { %441 = shalt.err (!%p438_p3)
}
 0x202   :  { %302 = dma.vmem_to_hbm [thread:$0]  %s300_s23, 128, %s533_s3, [#allocation4]  }
 0x203   :  { %446 = dma.done.wait [#allocation4], 128  }
 0x204   :  { %447 = vsyncadd [#allocation4], 4294967168 }
 0x205   :  { %306 = vsyncpa [#allocation3], 1 }
 0x206   :  { %307 = vsyncpa [#allocation6], 1 }
 0x207   :  { %308 = vsyncpa [#allocation4], 1 }

</bundles_post_ra>
